<compile_context>
chip_gen: v5e
topology: v5e:2x2
jax: 0.10.0
libtpu: 0.0.40
codegen_flags: <defaults>
</compile_context>

<pallas_src>
import functools
import math

import jax
import jax.numpy as jnp
from jax.experimental import pallas as pl
from jax.experimental.pallas import tpu as pltpu

_LANE = 128


# ---------------------------------------------------------------------------
# Kernels (all operate on lane-dense (ts, B*D) tiles; pe tile is (ts, D))
# ---------------------------------------------------------------------------

def _add_pe_kernel(x_ref, pe_ref, o_ref, *, batch, d):
    # Eval / p == 0 path: per-batch-chunk add (reuses the small pe vregs, lane-dense
    # 128-wide stores, no broadcast intermediate).
    pe_tile = pe_ref[...]
    for b in range(batch):
        sl = slice(b * d, (b + 1) * d)
        o_ref[:, sl] = x_ref[:, sl] + pe_tile


def _add_pe_dropout_hw_kernel(seed_ref, x_ref, pe_ref, o_ref, *, batch, d,
                              threshold24, scale):
    # Per-tile seed so every grid step draws an independent dropout mask.
    # NOTE: reusing the same `seed` across calls/layers repeats masks (caller's duty).
    pltpu.prng_seed(seed_ref[0] + pl.program_id(0))
    pe_tile = pe_ref[...]
    sc = jnp.asarray(scale, x_ref.dtype)       # 1/(1-p), rounded to input dtype
    thr = jnp.uint32(threshold24)
    for b in range(batch):
        sl = slice(b * d, (b + 1) * d)
        bits = pltpu.bitcast(pltpu.prng_random_bits(pe_tile.shape), jnp.uint32)
        keep = (bits >> 8) >= thr              # uniform in [0, 2^24); P(keep) = 1 - p
        y = (x_ref[:, sl] + pe_tile) * sc
        o_ref[:, sl] = jnp.where(keep, y, jnp.zeros_like(y))


def _add_pe_dropout_bits_kernel(x_ref, pe_ref, bits_ref, o_ref, *, batch, d,
                                threshold24, scale):
    # Fallback path: random bits precomputed on the host, tiled like x.
    pe_tile = pe_ref[...]
    sc = jnp.asarray(scale, x_ref.dtype)
    thr = jnp.uint32(threshold24)
    for b in range(batch):
        sl = slice(b * d, (b + 1) * d)
        keep = (bits_ref[:, sl] >> 8) >= thr
        y = (x_ref[:, sl] + pe_tile) * sc
        o_ref[:, sl] = jnp.where(keep, y, jnp.zeros_like(y))


# ---------------------------------------------------------------------------
# Host-side helpers
# ---------------------------------------------------------------------------

def make_positional_encoding_buffer(d_model: int, max_len: int = 5000) -> jnp.ndarray:
    """Same math as the PyTorch __init__ (pe: [max_len, 1, d_model], float32)."""
    position = jnp.arange(max_len, dtype=jnp.float32)[:, None]                 # (L, 1)
    div_term = jnp.exp(
        jnp.arange(0, d_model, 2, dtype=jnp.float32) * (-math.log(10000.0) / d_model)
    )
    pe = jnp.zeros((max_len, 1, d_model), dtype=jnp.float32)
    pe = pe.at[:, 0, 0::2].set(jnp.sin(position * div_term))
    pe = pe.at[:, 0, 1::2].set(jnp.cos(position * div_term)[:, : d_model // 2])
    return pe


def _on_tpu() -> bool:
    try:
        return jax.default_backend() == "tpu"
    except Exception:
        return False


def _chip_params():
    """(target tile bytes for x, vmem_limit_bytes) per TPU generation.

    Pure HBM-streaming kernel: bigger tiles amortize the ~0.35 us/step overhead.
      v5e (~0.8 TB/s):   2 MiB tiles already <7% overhead; 32 MiB limit (default is 16).
      v6e (~1.4 TB/s):   8 MiB tiles -> ~2-3% overhead; 128 MiB physical, 64 MiB limit.
      v7x (~3.2 TB/s):   ~5 MiB tiles (VMEM is only 64 MiB physical); 48 MiB limit.
    Budget per step ~ 2x x-tile + 2x out-tile + small pe + PRNG temps ~ 4.5-5x tile.
    """
    kind = ""
    try:
        kind = jax.devices()[0].device_kind.lower()
    except Exception:
        pass
    if ("v5 lite" in kind) or ("v5e" in kind) or ("v5litepod" in kind):
        return 2 * 1024 * 1024, 32 * 1024 * 1024
    if ("v6" in kind) or ("trillium" in kind):
        return 8 * 1024 * 1024, 64 * 1024 * 1024
    if "v7" in kind:
        return 5 * 1024 * 1024, 48 * 1024 * 1024
    return 4 * 1024 * 1024, 48 * 1024 * 1024     # unknown / future: conservative


def _pick_block_rows(n_rows: int, row_bytes: int, tile_bytes_target: int,
                     requested=None) -> int:
    """Rows per grid step.  Always a multiple of 8 (or the full row count); never
    falls back to one giant block -- the grid uses pl.cdiv so a non-dividing tile
    just produces a masked tail block."""
    if requested is None:
        requested = max(1, tile_bytes_target // max(row_bytes, 1))
    ts = min(int(requested), n_rows)
    if ts >= n_rows:
        return n_rows                          # single full block (block == array dim)
    ts -= ts % 8
    if ts < 8:
        ts = min(8, n_rows)
    return ts


def positional_encoding_forward(
    x: jnp.ndarray,
    pe: jnp.ndarray,
    seed: int,
    *,
    p: float = 0.1,
    train: bool = True,
    block_rows=None,
) -> jnp.ndarray:
    """x: (seq_len, batch, d_model); returns dropout(x + pe[:seq_len])."""
    assert 0.0 <= p < 1.0, "dropout p must be in [0, 1)"
    S, B, D = x.shape
    dtype = x.dtype

    # Keep lane slices 128-aligned: pad d_model up to a multiple of 128 if needed so
    # every per-batch chunk add/store is unmasked and lane-dense.  (One XLA pad/slice
    # round-trip; only taken for non-aligned d_model.)
    # TODO(synk): for non-128-aligned d_model a fused in-kernel pad would avoid the
    # extra HBM pass; not needed for the common aligned case.
    Dp = ((D + _LANE - 1) // _LANE) * _LANE
    if Dp != D:
        x_work = jnp.pad(x, ((0, 0), (0, 0), (0, Dp - D)))
        pe2d = jnp.pad(pe[:S, 0, :], ((0, 0), (0, Dp - D))).astype(dtype)
    else:
        x_work = x
        pe2d = pe[:S, 0, :].astype(dtype)                                      # (S, D)

    x_slab = x_work.reshape(S, B * Dp)        # lane-dense 2-D slab (free reshape)

    tile_bytes, vmem_limit = _chip_params()
    row_bytes = B * Dp * jnp.dtype(dtype).itemsize
    ts = _pick_block_rows(S, row_bytes, tile_bytes, block_rows)
    grid = (pl.cdiv(S, ts),)                  # tail block masked if ts doesn't divide S

    x_spec = pl.BlockSpec((ts, B * Dp), lambda i: (i, 0))
    pe_spec = pl.BlockSpec((ts, Dp), lambda i: (i, 0))
    out_spec = pl.BlockSpec((ts, B * Dp), lambda i: (i, 0))
    out_shape = jax.ShapeDtypeStruct((S, B * Dp), dtype)

    compiler_params = pltpu.CompilerParams(
        # Seq-tile axis is independent -> shard across TensorCores where available
        # (near-no-op on single-TC v5e/v6e, splits the stream on 2-TC v7x).
        dimension_semantics=("parallel",),
        vmem_limit_bytes=vmem_limit,
    )

    apply_dropout = bool(train) and p > 0.0
    if not apply_dropout:
        kernel = functools.partial(_add_pe_kernel, batch=B, d=Dp)
        out = pl.pallas_call(
            kernel,
            out_shape=out_shape,
            grid=grid,
            in_specs=[x_spec, pe_spec],
            out_specs=out_spec,
            compiler_params=compiler_params,
        )(x_slab, pe2d)
    else:
        # threshold clamped to 2^24-1, so p extremely close to 1 slightly undershoots;
        # scale is rounded to the input dtype (bf16-safe, negligible bias).
        threshold24 = min(int(round(p * float(1 << 24))), (1 << 24) - 1)
        scale = 1.0 / (1.0 - p)

        if _on_tpu():
            kernel = functools.partial(
                _add_pe_dropout_hw_kernel, batch=B, d=Dp,
                threshold24=threshold24, scale=scale)
            seed_arr = jnp.asarray([seed], dtype=jnp.int32)
            out = pl.pallas_call(
                kernel,
                out_shape=out_shape,
                grid=grid,
                in_specs=[
                    pl.BlockSpec(memory_space=pltpu.SMEM),   # seed scalar
                    x_spec,
                    pe_spec,
                ],
                out_specs=out_spec,
                compiler_params=compiler_params,
            )(seed_arr, x_slab, pe2d)
        else:
            # TODO(synk): pltpu.prng_* has no CPU/interpret lowering; feed host bits.
            bits = jax.random.bits(jax.random.PRNGKey(seed), (S, B * Dp),
                                   dtype=jnp.uint32)
            kernel = functools.partial(
                _add_pe_dropout_bits_kernel, batch=B, d=Dp,
                threshold24=threshold24, scale=scale)
            out = pl.pallas_call(
                kernel,
                out_shape=out_shape,
                grid=grid,
                in_specs=[x_spec, pe_spec, x_spec],
                out_specs=out_spec,
                compiler_params=compiler_params,
            )(x_slab, pe2d, bits)

    out = out.reshape(S, B, Dp)
    if Dp != D:
        out = out[:, :, :D]
    return out


# ---------------------------------------------------------------------------
# Demo / self-check
# ---------------------------------------------------------------------------

if __name__ == "__main__":
    import numpy as np

    seq_len, batch, d_model, max_len = 64, 2, 128, 128
    dropout_p = 0.2   # matches the module's global `dropout = 0.2`

    key = jax.random.PRNGKey(0)
    x = jax.random.normal(key, (seq_len, batch, d_model), dtype=jnp.float32)
    pe = make_positional_encoding_buffer(d_model, max_len)

    ref_np = np.asarray(x + pe[:seq_len])                  # (S, B, D)

    # --- Training path (dropout on); block_rows=8 -> 8 grid steps, pipeline exercised.
    out = positional_encoding_forward(x, pe, seed=0, p=dropout_p, train=True,
                                      block_rows=8)
    out = jax.block_until_ready(out)
    out_np = np.asarray(out)
    scaled = ref_np / (1.0 - dropout_p)

    assert out_np.shape == (seq_len, batch, d_model)
    is_zero = np.isclose(out_np, 0.0, atol=1e-6)
    is_kept = np.isclose(out_np, scaled, rtol=1e-5, atol=1e-5)
    assert np.all(is_zero | is_kept), "dropout output inconsistent with (x + pe) scaling"
    drop_frac = float(np.mean(is_zero))
    assert 0.05 < drop_frac < 0.45, f"unexpected drop fraction {drop_frac}"

    # --- Training path with auto tile sizing (generation-aware picker).
    out_auto = positional_encoding_forward(x, pe, seed=3, p=dropout_p, train=True)
    out_auto = jax.block_until_ready(out_auto)
    out_auto_np = np.asarray(out_auto)
    assert np.all(np.isclose(out_auto_np, 0.0, atol=1e-6)
                  | np.isclose(out_auto_np, scaled, rtol=1e-5, atol=1e-5))

    # --- Eval path (no dropout) must match x + pe exactly.
    out_eval = positional_encoding_forward(x, pe, seed=0, p=dropout_p, train=False,
                                           block_rows=8)
    out_eval = jax.block_until_ready(out_eval)
    assert np.allclose(np.asarray(out_eval), ref_np, rtol=1e-6, atol=1e-6)

    # --- Non-dividing seq length (masked tail block via pl.cdiv grid).
    s_odd = 60
    out_tail = positional_encoding_forward(x[:s_odd], pe, seed=0, p=dropout_p,
                                           train=False, block_rows=16)
    out_tail = jax.block_until_ready(out_tail)
    assert np.allclose(np.asarray(out_tail), ref_np[:s_odd], rtol=1e-6, atol=1e-6)

    print("KERNEL_OK")
</pallas_src>

<mosaic_0001>
module attributes {stable_mosaic.version = 11 : i64} {
  func.func @_add_pe_dropout_bits_kernel(%arg0: i32, %arg1: memref<8x256xf32, #tpu.memory_space<vmem>>, %arg2: memref<8x128xf32, #tpu.memory_space<vmem>>, %arg3: memref<8x256xi32, #tpu.memory_space<vmem>>, %arg4: memref<8x256xf32, #tpu.memory_space<vmem>>) attributes {dimension_semantics = [#tpu.dimension_semantics<parallel>], iteration_bounds = array<i64: 8>, scalar_prefetch = 0 : i64, scratch_operands = 0 : i64, tpu.core_type = #tpu.core_type<tc>, window_params = [{transform_indices = @transform_0, window_bounds = array<i64: 8, 256>}, {transform_indices = @transform_1, window_bounds = array<i64: 8, 128>}, {transform_indices = @transform_2, window_bounds = array<i64: 8, 256>}, {transform_indices = @transform_3, window_bounds = array<i64: 8, 256>}]} {
    %c0 = arith.constant 0 : index
    %c0_0 = arith.constant 0 : index
    %0 = vector.load %arg2[%c0, %c0_0] : memref<8x128xf32, #tpu.memory_space<vmem>>, vector<8x128xf32>
    %c0_1 = arith.constant 0 : index
    %c0_2 = arith.constant 0 : index
    %1 = vector.load %arg3[%c0_1, %c0_2] : memref<8x256xi32, #tpu.memory_space<vmem>>, vector<8x128xi32>
    %c8_i32 = arith.constant 8 : i32
    %2 = vector.broadcast %c8_i32 : i32 to vector<8x128xi32>
    %3 = arith.shrui %1, %2 : vector<8x128xi32>
    %c3355443_i32 = arith.constant 3355443 : i32
    %4 = vector.broadcast %c3355443_i32 : i32 to vector<8x128xi32>
    %5 = arith.cmpi uge, %3, %4 : vector<8x128xi32>
    %c0_3 = arith.constant 0 : index
    %c0_4 = arith.constant 0 : index
    %6 = vector.load %arg1[%c0_3, %c0_4] : memref<8x256xf32, #tpu.memory_space<vmem>>, vector<8x128xf32>
    %7 = arith.addf %6, %0 : vector<8x128xf32>
    %cst = arith.constant 1.250000e+00 : f32
    %8 = vector.broadcast %cst : f32 to vector<8x128xf32>
    %9 = arith.mulf %7, %8 : vector<8x128xf32>
    %cst_5 = arith.constant 0.000000e+00 : f32
    %10 = vector.broadcast %cst_5 : f32 to vector<8x128xf32>
    %11 = arith.select %5, %9, %10 : vector<8x128xi1>, vector<8x128xf32>
    %c0_6 = arith.constant 0 : index
    %c0_7 = arith.constant 0 : index
    %12 = vector.load %arg4[%c0_6, %c0_7] : memref<8x256xf32, #tpu.memory_space<vmem>>, vector<8x128xf32>
    tpu.vector_store %arg4[%c0_6, %c0_7], %11 {strides = array<i32>} : memref<8x256xf32, #tpu.memory_space<vmem>>, vector<8x128xf32>,
    %c0_8 = arith.constant 0 : index
    %c128 = arith.constant 128 : index
    %13 = vector.load %arg3[%c0_8, %c128] : memref<8x256xi32, #tpu.memory_space<vmem>>, vector<8x128xi32>
    %c8_i32_9 = arith.constant 8 : i32
    %14 = vector.broadcast %c8_i32_9 : i32 to vector<8x128xi32>
    %15 = arith.shrui %13, %14 : vector<8x128xi32>
    %c3355443_i32_10 = arith.constant 3355443 : i32
    %16 = vector.broadcast %c3355443_i32_10 : i32 to vector<8x128xi32>
    %17 = arith.cmpi uge, %15, %16 : vector<8x128xi32>
    %c0_11 = arith.constant 0 : index
    %c128_12 = arith.constant 128 : index
    %18 = vector.load %arg1[%c0_11, %c128_12] : memref<8x256xf32, #tpu.memory_space<vmem>>, vector<8x128xf32>
    %19 = arith.addf %18, %0 : vector<8x128xf32>
    %cst_13 = arith.constant 1.250000e+00 : f32
    %20 = vector.broadcast %cst_13 : f32 to vector<8x128xf32>
    %21 = arith.mulf %19, %20 : vector<8x128xf32>
    %cst_14 = arith.constant 0.000000e+00 : f32
    %22 = vector.broadcast %cst_14 : f32 to vector<8x128xf32>
    %23 = arith.select %17, %21, %22 : vector<8x128xi1>, vector<8x128xf32>
    %c0_15 = arith.constant 0 : index
    %c128_16 = arith.constant 128 : index
    %24 = vector.load %arg4[%c0_15, %c128_16] : memref<8x256xf32, #tpu.memory_space<vmem>>, vector<8x128xf32>
    tpu.vector_store %arg4[%c0_15, %c128_16], %23 {strides = array<i32>} : memref<8x256xf32, #tpu.memory_space<vmem>>, vector<8x128xf32>,
    return
  }
  func.func @transform_0(%arg0: i32) -> (i32, i32) {
    %c0_i32 = arith.constant 0 : i32
    %c0_i32_0 = arith.constant 0 : i32
    return %arg0, %c0_i32 : i32, i32
  }
  func.func @transform_1(%arg0: i32) -> (i32, i32) {
    %c0_i32 = arith.constant 0 : i32
    %c0_i32_0 = arith.constant 0 : i32
    return %arg0, %c0_i32 : i32, i32
  }
  func.func @transform_2(%arg0: i32) -> (i32, i32) {
    %c0_i32 = arith.constant 0 : i32
    %c0_i32_0 = arith.constant 0 : i32
    return %arg0, %c0_i32 : i32, i32
  }
  func.func @transform_3(%arg0: i32) -> (i32, i32) {
    %c0_i32 = arith.constant 0 : i32
    %c0_i32_0 = arith.constant 0 : i32
    return %arg0, %c0_i32 : i32, i32
  }
}

</mosaic_0001>

<bundles_post_ra>
// kernel: tpu_custom_call.1
= control target key start
LH: loop header
LB: loop body
LE: loop exit
PB: predicated region body
PF: predicated region fallthrough
CT: control target
= control target key end

     0   :  { %s851_s0 = inlined_call_operand.hbm [shape: f32[64,256], index: 0, kind: input, shape index: {}]   ;;  %s852_s1 = inlined_call_operand.hbm [shape: f32[64,128], index: 1, kind: input, shape index: {}]   ;;  %s853_s2 = inlined_call_operand.hbm [shape: u32[64,256], index: 2, kind: input, shape index: {}]   ;;  %s854_s3 = inlined_call_operand.hbm [shape: f32[64,256], index: 3, kind: output, shape index: {}]  }
   0x1   :  { %856 = sst [smem:[#allocation14_spill]] %s852_s1 }
   0x2   :  { %8 = vsyncpa [#allocation3], 0 }
   0x3   :  { %10 = vsyncpa [#allocation3 + $0x1], 0 }
   0x4   :  { %11 = vsyncpa [#allocation6], 0 }
   0x5   :  { %13 = vsyncpa [#allocation6 + $0x1], 0 }
   0x6   :  { %14 = vsyncpa [#allocation4], 0 }
   0x7   :  { %16 = vsyncpa [#allocation4 + $0x1], 0  ;;  %s680_s12 = smov 0   ;;  %s682_s13 = smov 0  }
   0x8   :  { %s684_s14 = smov 0   ;;  %s686_s15 = smov 0  }
   0x9 LB: > { %857 = sst [smem:[#allocation12_spill]] %s654_s14  ;;  %s701_s16 = sadd.s32 4294967295, %s658_s15   ;;  %s658_s15 = sphi %s686_s15, %s870_s15   ;;  %s654_s14 = sphi %s684_s14, %s869_s14   ;;  %s650_s13 = sphi %s682_s13, %s868_s13   ;;  %s646_s12 = sphi %s680_s12, %s867_s12  }
   0xa   : > { %s416_s17 = sadd.s32 4294967294, %s658_s15   ;;  %s705_s18 = sadd.s32 1, %s658_s15  }
   0xb   : > { %s29_s19 = sadd.s32 1, %s654_s14  ;;  %s26_s20 = ssub.s32 %s658_s15, %s705_s18 }
   0xc   : > { %p36_p0 = scmp.ne.s32.totalorder %s654_s14, %s650_s13  ;;  %p27_p1 = scmp.eq.s32.totalorder %s26_s20, 0 }
   0xd   : > { %p37_p2 = scmp.eq.s32.totalorder %s658_s15, 0  ;;  %p42_p3 = scmp.ne.s32.totalorder %s650_s13, %s646_s12 }
   0xe   : > { %p43_p4 = scmp.eq.s32.totalorder %s701_s16, 0  ;;  %p118_p7 = scmp.eq.s32.totalorder %s701_s16, 7 }
   0xf   : > { %s717_s21 = scalar_select %p27_p1, %s654_s14, %s29_s19  }
  0x10   : > { %p38_p5 = por %p37_p2, %p36_p0  ;;  %p719_p6 = por %p43_p4, %p42_p3 }
  0x11   : > { %858 = sst [smem:[#allocation13_spill]] %s717_s21  ;;  %p124_p8 = scmp.eq.s32.totalorder %s416_s17, 7 }
  0x12   : > { %p464_p9 = scmp.lt.s32.totalorder %s658_s15, 8  ;;  %p725_p10 = por %p118_p7, %p36_p0 }
  0x13   : > { %p729_p11 = por %p124_p8, %p42_p3  ;;  %s734_s25 = sand.u32 1, %s654_s14  }
  0x14   : > { %p736_p12 = pnand %p464_p9, %p38_p5  ;;  %s164_s27 = sand.u32 1, %s658_s15  }
  0x15   : > { %s422_s28 = sshll.u32 %s734_s25, 3  ;;  %s423_s29 = sshll.u32 %s658_s15, 3 }
  0x16   : > { %s863_s1 = sld [smem:[#allocation14_spill]]  ;;  %s168_s6 = scalar_lea.vmem [#allocation5], %s422_s28 }
  0x17   : > { %s176_s7 = sshll.u32 %s168_s6, 4  ;;  %p427_p13 = scmp.ge.s32.totalorder %s658_s15, 1  ;;  %s177_s7 = int_to_ptr.vmem [resolvable:$true] %s176_s7 }
  0x18   : > { %s747_s9 = scalar_lea.sflag [#allocation6], %s164_s27  ;;  %p502_p1 = pneg %p736_p12 }
  0x1c   : > { %s172_s5 = scalar_lea.hbm %s863_s1, %s423_s29  ;;  %s505_s20 = scalar_lea.hbm %s863_s1, 64 }
  0x1d   : > { %s174_s8 = sshll.u32 %s172_s5, 4  ;;  %s175_s8 = int_to_ptr.hbm [resolvable:$true] %s174_s8 }
  0x1e   : > { %s498_s10 = sshra.s32 %s175_s8, 4  ;;  %s499_s10 = int_to_ptr.hbm [resolvable:$true] %s498_s10 }
  0x1f   : > { %s500_s11 = scalar_lea.hbm %s499_s10, 8  ;;  %p506_p4 = scmp.lt.s32.totalorder %s499_s10, %s863_s1 }
  0x20   : > { %p501_p0 = scmp.ne.s32.totalorder %s499_s10, %s500_s11  ;;  %p507_p5 = scmp.lt.s32.totalorder %s505_s20, %s500_s11 }
  0x22   : > { %p503_p2 = pnand %p502_p1, %p501_p0  ;;  %p508_p7 = por %p507_p5, %p506_p4 }
  0x24   : > { %p504_p3 = pneg %p503_p2 }
  0x26   : > { %p509_p8 = pnand %p508_p7, %p504_p3 }
  0x28   : > { %512 = shalt.err (!%p509_p8)
}
  0x29   : > { %456 = dma.hbm_to_vmem [thread:$0]  (!%p736_p12), %s175_s8, 128, %s177_s7, %s747_s9  }
  0x2a   : > { %p201_p9 = scmp.lt.s32.totalorder %s658_s15, 9  ;;  %s419_s27 = sshll.u32 %s734_s25, 4 }
  0x2b   : > { %s439_s30 = sshll.u32 %s658_s15, 4  ;;  %s148_s11 = scalar_lea.vmem [#allocation2], %s419_s27 }
  0x2c   : > { %p768_p0 = pnand %p427_p13, %p201_p9  ;;  %s153_s10 = scalar_lea.hbm %s851_s0, %s439_s30 }
  0x2d   : > { %s157_s17 = sshll.u32 %s148_s11, 4  ;;  %s155_s19 = sshll.u32 %s153_s10, 4  ;;  %s158_s17 = int_to_ptr.vmem [resolvable:$true] %s157_s17  ;;  %s156_s19 = int_to_ptr.hbm [resolvable:$true] %s155_s19 }
  0x2e   : > { %s145_s20 = scalar_lea.sflag [#allocation3], %s734_s25  ;;  %s528_s7 = sshra.s32 %s156_s19, 4  ;;  %s529_s7 = int_to_ptr.hbm [resolvable:$true] %s528_s7 }
  0x2f   : > { %s530_s8 = scalar_lea.hbm %s529_s7, 16  ;;  %s535_s1 = scalar_lea.hbm %s851_s0, 128 }
  0x30   : > { %p531_p2 = scmp.ne.s32.totalorder %s529_s7, %s530_s8  ;;  %p536_p4 = scmp.lt.s32.totalorder %s529_s7, %s851_s0 }
  0x31   : > { %p537_p5 = scmp.lt.s32.totalorder %s535_s1, %s530_s8 }
  0x32   : > { %p533_p13 = pnand %p531_p2, %p502_p1 }
  0x33   : > { %p538_p7 = por %p537_p5, %p536_p4 }
  0x34   : > { %p534_p3 = pneg %p533_p13 }
  0x36   : > { %p539_p8 = pnand %p538_p7, %p534_p3 }
  0x38   : > { %542 = shalt.err (!%p539_p8)
}
  0x39   : > { %453 = dma.hbm_to_vmem [thread:$0]  (!%p736_p12), %s156_s19, 256, %s158_s17, %s145_s20  }
  0x3a   : > { %s192_s11 = scalar_lea.hbm %s853_s2, %s439_s30  ;;  %s187_s21 = scalar_lea.vmem [#allocation7], %s419_s27 }
  0x3b   : > { %s196_s14 = sshll.u32 %s187_s21, 4  ;;  %s194_s28 = sshll.u32 %s192_s11, 4  ;;  %s197_s14 = int_to_ptr.vmem [resolvable:$true] %s196_s14  ;;  %s195_s28 = int_to_ptr.hbm [resolvable:$true] %s194_s28 }
  0x3c   : > { %s558_s29 = sshra.s32 %s195_s28, 4  ;;  %s565_s17 = scalar_lea.hbm %s853_s2, 128  ;;  %s559_s29 = int_to_ptr.hbm [resolvable:$true] %s558_s29 }
  0x3d   : > { %s560_s7 = scalar_lea.hbm %s559_s29, 16  ;;  %p566_p3 = scmp.lt.s32.totalorder %s559_s29, %s853_s2 }
  0x3e   : > { %p561_p9 = scmp.ne.s32.totalorder %s559_s29, %s560_s7  ;;  %p567_p4 = scmp.lt.s32.totalorder %s565_s17, %s560_s7 }
  0x40   : > { %p563_p2 = pnand %p561_p9, %p502_p1  ;;  %p568_p5 = por %p567_p4, %p566_p3 }
  0x42   : > { %p564_p13 = pneg %p563_p2 }
  0x44   : > { %p569_p7 = pnand %p568_p5, %p564_p13 }
  0x46   : > { %572 = shalt.err (!%p569_p7)
}
  0x47   : > { %459 = dma.hbm_to_vmem [thread:$0]  (!%p736_p12), %s195_s28, 256, %s197_s14, %s747_s9  }
  0x48   : > { %205 = sbr.rel (%p768_p0) target bundleno = 96 (0x60), region = 32  ;;  %s805_s21 = sand.u32 (!%p768_p0), 1, %s650_s13  }
  0x49   : > { %s428_s27 = sshll.u32 (!%p768_p0), %s805_s21, 4  ;;  %s208_s30 = scalar_lea.sflag (!%p768_p0), [#allocation3], %s805_s21 }
  0x4a   : > { %s211_s5 = scalar_lea.vmem (!%p768_p0), [#allocation2], %s428_s27 }
  0x4d   : > { %633 = dma.done.wait (%p719_p6), %s208_s30, 256  }
  0x4e   : > { %635 = vsyncadd (%p719_p6), %s208_s30, 4294967040  ;;  %s217_s14 = sand.u32 1, %s701_s16   ;;  %s429_s26 = sshll.u32 %s805_s21, 3 }
  0x4f   : > { %s218_s9 = scalar_lea.sflag [#allocation6], %s217_s14  ;;  %s221_s4 = scalar_lea.vmem [#allocation5], %s429_s26 }
  0x50   : > { %637 = dma.done.wait (%p719_p6), %s218_s9, 384  }
  0x51   : > { %639 = vsyncadd (%p719_p6), %s218_s9, 4294966912  ;;  %s441_s6 = sshll.u32 %s701_s16, 4  ;;  %v265_v0 = vld [vmem:[%s221_s4] sm:$0xff]  ;;  %s231_s25 = scalar_lea.vmem [#allocation7], %s428_s27  ;;  %v281_v6 = vld [vmem:[%s211_s5 + $0x8] sm:$0xff] }
  0x52   : > { %v266_v1 = vld [vmem:[%s231_s25] sm:$0xff]  ;;  %v271_v2 = vld [vmem:[%s211_s5] sm:$0xff]  ;;  %s298_s28 = scalar_lea.hbm %s854_s3, %s441_s6  ;;  %v276_v5 = vld [vmem:[%s231_s25 + $0x8] sm:$0xff]  ;;  %v282_v8 = vadd.f32 %v281_v6, %v265_v0  ;;  %s264_s22 = scalar_lea.vmem [#allocation8], %s428_s27 }
  0x53   : > { %v267_v3 = vshrl.u32 %v266_v1, 8  ;;  %v272_v4 = vadd.f32 %v271_v2, %v265_v0  ;;  %v277_v7 = vshrl.u32 %v276_v5, 8  ;;  %s300_s29 = sshll.u32 %s264_s22, 4  ;;  %s302_s16 = sshll.u32 %s298_s28, 4  ;;  %s301_s29 = int_to_ptr.vmem [resolvable:$true] %s300_s29  ;;  %s303_s16 = int_to_ptr.hbm [resolvable:$true] %s302_s16 }
  0x54   : > { %v283_v12 = vmul.f32 1.25, %v282_v8  ;;  %s287_s7 = scalar_lea.sflag [#allocation4], %s805_s21  ;;  %s602_s1 = sshra.s32 %s303_s16, 4  ;;  %s603_s1 = int_to_ptr.hbm [resolvable:$true] %s602_s1 }
  0x55   : > { %v432_v9 = vxor.u32 2147483648, %v267_v3  ;;  %v273_v10 = vmul.f32 1.25, %v272_v4  ;;  %v433_v11 = vxor.u32 2147483648, %v277_v7  ;;  %s604_s8 = scalar_lea.hbm %s603_s1, 16  ;;  %s608_s20 = scalar_lea.hbm %s854_s3, 128 }
  0x56   : > { %p605_p6 = scmp.ne.s32.totalorder %s603_s1, %s604_s8  ;;  %p609_p0 = scmp.lt.s32.totalorder %s603_s1, %s854_s3 }
  0x57   : > { %vm270_vm0 = vcmp.ge.s32.totalorder %v432_v9, 2150839091  ;;  %vm280_vm1 = vcmp.ge.s32.totalorder %v433_v11, 2150839091  ;;  %p610_p8 = scmp.lt.s32.totalorder %s608_s20, %s604_s8 }
  0x58   : > { %v274_v13 = vsel %vm270_vm0, %v273_v10, 0.0  ;;  %v284_v14 = vsel %vm280_vm1, %v283_v12, 0.0  ;;  %p606_p12 = pnand %p605_p6, %p725_p10 }
  0x59   : > { %275 = vst [vmem:[%s264_s22] sm:$0xff] %v274_v13  ;;  %p611_p9 = por %p610_p8, %p609_p0 }
  0x5a   : > { %285 = vst [vmem:[%s264_s22 + $0x8] sm:$0xff] %v284_v14  ;;  %p607_p1 = pneg %p606_p12 }
  0x5c   : > { %p612_p2 = pnand %p611_p9, %p607_p1 }
  0x5e   : > { %615 = shalt.err (!%p612_p2)
}
  0x5f   : > { %448 = dma.vmem_to_hbm [thread:$0]  (%p725_p10), %s301_s29, 256, %s303_s16, %s287_s7  }
  0x60 PF: > { %p465_p13 = scmp.ge.s32.totalorder %s658_s15, 2  ;;  %s314_s21 = sand.u32 1, %s646_s12  }
  0x61   : > { %s315_s5 = scalar_lea.sflag [#allocation4], %s314_s21 }
  0x62   : > { %p461_p3 = pnand %p465_p13, %p729_p11 }
  0x64   : > { %p462_p4 = pneg %p461_p3 }
  0x66   : > { %641 = dma.done.wait (%p462_p4), %s315_s5, 256  }
  0x67   : > { %643 = vsyncadd (%p462_p4), %s315_s5, 4294967040  ;;  %s865_s14 = sld [smem:[#allocation12_spill]]  ;;  %p19_p5 = scmp.ge.s32.totalorder %s705_s18, 10  }
  0x68   : > { %s866_s26 = sld [smem:[#allocation13_spill]]  ;;  %s867_s12 = smov %s650_s13 }
  0x69   : > { %s870_s15 = smov %s705_s18 }
  0x6a   :  { %21 = sbr.rel (!%p19_p5) target bundleno = 9 (0x9), region = 101 }
  0x6d   : > { %s868_s13 = smov %s865_s14 }
  0x6e   : > { %s869_s14 = smov %s866_s26 }
  0x6f   :  { %321 = vsyncpa [#allocation3], 1 }
  0x70   :  { %323 = vsyncpa [#allocation3 + $0x1], 1 }
  0x71   :  { %324 = vsyncpa [#allocation6], 1 }
  0x72   :  { %326 = vsyncpa [#allocation6 + $0x1], 1 }
  0x73   :  { %327 = vsyncpa [#allocation4], 1 }
  0x74   :  { %329 = vsyncpa [#allocation4 + $0x1], 1 }

</bundles_post_ra>
